<compile_context>
chip_gen: v7x
topology: tpu7x:2x2x1
jax: 0.10.0
libtpu: 0.0.40
codegen_flags: <defaults>
</compile_context>

<pallas_src>
import jax
import jax.numpy as jnp
from jax.experimental import pallas as pl
from jax.experimental.pallas import tpu as pltpu


def _round_up(n, m):
    return ((n + m - 1) // m) * m


def linear_kernel(x_ref, w_ref, b_ref, o_ref):
    # x_ref: (TB, D) VMEM tile of the input (streamed, double-buffered)
    # w_ref: (1, D)  VMEM, lane-dense weight row (PyTorch layout, no transpose)
    # b_ref: (1, 1)  SMEM scalar bias
    # o_ref: (TB, 1) output tile
    x = x_ref[...].astype(jnp.float32)
    w = w_ref[...].astype(jnp.float32)            # broadcasts over batch rows
    # Kernel is HBM-bound: VPU elementwise multiply + XLU lane reduction hides
    # entirely under the x-tile DMA; an N=1 MXU matmul would use 1 of 128/256
    # result columns and buy nothing.
    acc = jnp.sum(x * w, axis=-1, keepdims=True)  # (TB, 1) f32
    o_ref[...] = (acc + b_ref[0, 0]).astype(o_ref.dtype)


def _block_batch_cap(D):
    """Largest batch tile whose double-buffered x working set stays inside the
    *default* scoped-VMEM budget of every TPU generation."""
    try:
        kind = jax.devices()[0].device_kind.lower()
    except Exception:
        kind = ""
    # v5e (and older): 16 MiB default scoped VMEM -> ~4 MiB per x tile
    # (8 MiB double-buffered).  v6e/v7x: 32 MiB default -> ~8 MiB per tile
    # (16 MiB double-buffered + ~4 MiB padded out buffers ~= 20 MiB, in budget).
    small_vmem = any(t in kind for t in ("v2", "v3", "v4", "v5"))
    tile_budget = (4 if small_vmem else 8) * 1024 * 1024
    return max(128, (tile_budget // (D * 4)) // 128 * 128)


def _choose_block_batch(B, D):
    cap = _block_batch_cap(D)
    if B <= 128:
        return _round_up(max(B, 1), 8)            # single block, grid=(1,)
    # Guarantee >=2 grid steps so dimension_semantics=("parallel",) can give one
    # half to each TensorCore on a v7x megacore; round to 128 so every block
    # stays sublane/lane aligned even when B % TB != 0.
    tb = _round_up(pl.cdiv(B, 2), 128)
    return int(min(cap, tb))


def linear_regression_forward(x, weight, bias, *, block_batch=None):
    """x: (B, D), weight: (1, D) (PyTorch nn.Linear layout), bias: (1,)."""
    B, D = x.shape
    TB = _choose_block_batch(B, D) if block_batch is None else _round_up(block_batch, 8)

    # No jnp.pad: grid covers B with a possibly-partial final block.
    grid = (pl.cdiv(B, TB),)

    b_smem = bias.reshape(1, 1)  # scalar bias lives in SMEM

    # TODO(synk): if D grows beyond a few thousand, add a second "arbitrary" grid
    # axis over D with a VMEM f32 accumulator (pl.when init/finalize) instead of
    # loading a full (TB, D) row block.
    out = pl.pallas_call(
        linear_kernel,
        out_shape=jax.ShapeDtypeStruct((B, 1), x.dtype),
        grid_spec=pltpu.PrefetchScalarGridSpec(
            num_scalar_prefetch=0,
            grid=grid,
            in_specs=[
                # Streamed, double-buffered x tiles.  If profiling ever shows
                # exposed DMA between steps, add pipeline_mode=pl.Buffered(3).
                pl.BlockSpec((TB, D), lambda i: (i, 0)),
                pl.BlockSpec((1, D), lambda i: (0, 0)),   # resident weight row
                pl.BlockSpec(memory_space=pltpu.SMEM),    # scalar bias in SMEM
            ],
            out_specs=pl.BlockSpec((TB, 1), lambda i: (i, 0)),
        ),
        compiler_params=pltpu.CompilerParams(
            # Batch tiles are independent -> shard across both TCs on v7x.
            dimension_semantics=("parallel",),
        ),
        # Advisory hint: bandwidth-heavy custom call, lets XLA overlap neighbours.
        cost_estimate=pl.CostEstimate(
            flops=2 * B * D,
            transcendentals=0,
            bytes_accessed=B * D * 4 + B * 4 + D * 4 + 4,
        ),
    )(x, weight, b_smem)

    return out


if __name__ == "__main__":
    input_dim = 512
    batch = 8

    key = jax.random.PRNGKey(0)
    kx, kw, kb = jax.random.split(key, 3)

    # Deterministic parameter init mimicking nn.Linear's uniform(-1/sqrt(D), 1/sqrt(D))
    bound = 1.0 / (input_dim ** 0.5)
    weight = jax.random.uniform(kw, (1, input_dim), jnp.float32, -bound, bound)
    bias = jax.random.uniform(kb, (1,), jnp.float32, -bound, bound)

    x = jax.random.normal(kx, (batch, input_dim), jnp.float32)

    out = linear_regression_forward(x, weight, bias)
    out = jax.block_until_ready(out)

    # Reference check in plain JAX
    ref = x @ weight.T + bias
    assert out.shape == (batch, 1)
    assert jnp.allclose(out, ref, atol=1e-5, rtol=1e-5)

    print("KERNEL_OK")
</pallas_src>

<mosaic_0001>
module attributes {stable_mosaic.version = 11 : i64} {
  func.func @linear_kernel(%arg0: i32, %arg1: memref<8x512xf32, #tpu.memory_space<vmem>>, %arg2: memref<1x512xf32, #tpu.memory_space<vmem>>, %arg3: memref<1x1xf32, #tpu.memory_space<smem>>, %arg4: memref<8x1xf32, #tpu.memory_space<vmem>>) attributes {dimension_semantics = [#tpu.dimension_semantics<parallel>], iteration_bounds = array<i64: 1>, scalar_prefetch = 0 : i64, scratch_operands = 0 : i64, tpu.core_type = #tpu.core_type<tc>, window_params = [{transform_indices = @transform_0, window_bounds = array<i64: 8, 512>}, {pipeline_mode = #tpu.pipeline_mode<synchronous>, transform_indices = @transform_1, window_bounds = array<i64: 1, 512>}, {transform_indices = @transform_2, window_bounds = array<i64: 1, 1>}, {transform_indices = @transform_3, window_bounds = array<i64: 8, 1>}]} {
    %c0 = arith.constant 0 : index
    %c0_0 = arith.constant 0 : index
    %0 = vector.load %arg1[%c0, %c0_0] : memref<8x512xf32, #tpu.memory_space<vmem>>, vector<8x512xf32>
    %c0_1 = arith.constant 0 : index
    %c0_2 = arith.constant 0 : index
    %1 = vector.load %arg2[%c0_1, %c0_2] : memref<1x512xf32, #tpu.memory_space<vmem>>, vector<1x512xf32>
    %2 = vector.broadcast %1 : vector<1x512xf32> to vector<8x512xf32>
    %3 = arith.mulf %0, %2 : vector<8x512xf32>
    %cst = arith.constant dense<0.000000e+00> : vector<8xf32>
    %4 = vector.multi_reduction <add>, %3, %cst [1] : vector<8x512xf32> to vector<8xf32>
    %5 = vector.shape_cast %4 : vector<8xf32> to vector<8x1xf32>
    %c0_3 = arith.constant 0 : index
    %c0_4 = arith.constant 0 : index
    %6 = memref.load %arg3[%c0_3, %c0_4] : memref<1x1xf32, #tpu.memory_space<smem>>
    %7 = vector.broadcast %6 : f32 to vector<8x1xf32>
    %8 = arith.addf %5, %7 : vector<8x1xf32>
    %c0_5 = arith.constant 0 : index
    %c0_6 = arith.constant 0 : index
    %9 = vector.load %arg4[%c0_5, %c0_6] : memref<8x1xf32, #tpu.memory_space<vmem>>, vector<8x1xf32>
    tpu.vector_store %arg4[%c0_5, %c0_6], %8 {strides = array<i32>} : memref<8x1xf32, #tpu.memory_space<vmem>>, vector<8x1xf32>,
    return
  }
  func.func @transform_0(%arg0: i32) -> (i32, i32) {
    %c0_i32 = arith.constant 0 : i32
    %c0_i32_0 = arith.constant 0 : i32
    return %arg0, %c0_i32 : i32, i32
  }
  func.func @transform_1(%arg0: i32) -> (i32, i32) {
    %c0_i32 = arith.constant 0 : i32
    %c0_i32_0 = arith.constant 0 : i32
    %c0_i32_1 = arith.constant 0 : i32
    return %c0_i32, %c0_i32_0 : i32, i32
  }
  func.func @transform_2(%arg0: i32) -> (i32, i32) {
    %c0_i32 = arith.constant 0 : i32
    %c0_i32_0 = arith.constant 0 : i32
    %c0_i32_1 = arith.constant 0 : i32
    return %c0_i32, %c0_i32_0 : i32, i32
  }
  func.func @transform_3(%arg0: i32) -> (i32, i32) {
    %c0_i32 = arith.constant 0 : i32
    %c0_i32_0 = arith.constant 0 : i32
    return %arg0, %c0_i32 : i32, i32
  }
}

</mosaic_0001>

<bundles_post_ra>
// kernel: tpu_custom_call.1
= control target key start
LH: loop header
LB: loop body
LE: loop exit
PB: predicated region body
PF: predicated region fallthrough
CT: control target
= control target key end

     0   :  { %9 = vsyncpa [#allocation4], 0  ;;  %s97_s12 = smov [#allocation3]   ;;  %s139_s0 = inlined_call_operand.hbm [shape: f32[8,512], index: 0, kind: input, shape index: {}]   ;;  %s140_s1 = inlined_call_operand.vmem [shape: f32[1,512], index: 1, kind: input, shape index: {}]   ;;  %s141_s2 = inlined_call_operand.<no memory space> [shape: f32[1,1], index: 2, kind: input, shape index: {}]   ;;  %s142_s3 = inlined_call_operand.vmem [shape: f32[8,1], index: 3, kind: output, shape index: {}]  }
   0x1   :  { %s16_s13 = sshll.u32 %s97_s12, 4  ;;  %s73_s16 = scalar_lea.hbm %s139_s0, 512  ;;  %s17_s13 = int_to_ptr.vmem [resolvable:$true] %s16_s13 }
   0x2   :  { %p74_p0 = scmp.ne.s32.totalorder %s139_s0, %s73_s16  ;;  %p77_p1 = scmp.lt.u32.totalorder %s73_s16, %s139_s0 }
   0x4   :  { %p79_p2 = pnand %p77_p1, %p74_p0 }
   0x6   :  { %82 = shalt.err (!%p79_p2)
}
   0x7   :  { %s83_s21 = scalar_lea.vmem %s17_s13, 512  ;;  %p88_p4 = scmp.lt.s32.totalorder %s17_s13, %s17_s13 }
   0x8   :  { %p84_p3 = scmp.ne.s32.totalorder %s17_s13, %s83_s21  ;;  %p89_p5 = scmp.lt.s32.totalorder %s83_s21, %s83_s21 }
   0xa   :  { %p90_p6 = por %p89_p5, %p88_p4 }
   0xc   :  { %p91_p7 = pnand %p90_p6, %p84_p3 }
   0xe   :  { %94 = shalt.err (!%p91_p7)
}
   0xf   :  { %19 = dma.hbm_to_vmem [thread:$0]  %s139_s0, 512, %s17_s13, [#allocation4]  }
  0x10   :  { %95 = dma.done.wait [#allocation4], 512  }
  0x11   :  { %96 = vsyncadd [#allocation4], 4294966784  ;;  %v33_v0 = vlaneseq  ;;  %v27_v6 = vld [vmem:[#allocation3] sm:$0xff]  ;;  %v28_v7 = vld [vmem:[#allocation3 + $0x8] sm:$0xff]  ;;  %v63_v22 = vstv %s141_s2  ;;  %vm65_vm0 = vcmask 7168  }
  0x12   :  { %v29_v8 = vld [vmem:[#allocation3 + $0x10] sm:$0xff]  ;;  %v31_v9 = vld [vmem:[%s140_s1] sm:$0xf]  ;;  %v30_v14 = vld [vmem:[#allocation3 + $0x18] sm:$0xff] }
  0x13   :  { %v34_v1 = vshrl.u32 %v33_v0, 7 }
  0x15   :  { %v35_v2 = vsub.s32 0, %v34_v1  ;;  %v39_v3 = vsub.s32 1, %v34_v1  ;;  %v43_v4 = vsub.s32 2, %v34_v1  ;;  %v47_v5 = vsub.s32 3, %v34_v1 }
  0x17   :  { %v36_v10 = vrot.slane %v31_v9, %v35_v2  ;;  %v40_v11 = vrot.slane %v31_v9, %v39_v3  ;;  %v44_v12 = vrot.slane %v31_v9, %v43_v4  ;;  %v48_v13 = vrot.slane %v31_v9, %v47_v5 }
  0x19   :  { %v53_v15 = vmul.f32 %v36_v10, %v27_v6  ;;  %v54_v16 = vmul.f32 %v40_v11, %v28_v7  ;;  %v55_v17 = vmul.f32 %v44_v12, %v29_v8  ;;  %v56_v18 = vmul.f32 %v48_v13, %v30_v14 }
  0x1b   :  { %v57_v19 = vadd.f32 %v54_v16, %v53_v15 }
  0x1d   :  { %v58_v20 = vadd.f32 %v57_v19, %v55_v17 }
  0x1f   :  { %v59_v21 = vadd.f32 %v58_v20, %v56_v18 }
  0x21   :  { %60 = vadd.xlane.f32.xlu0 %v59_v21 }
  0xae   :  { %v61_v23 = vpop.xlane.xlu0 %60 }
  0xaf   :  { %v64_v24 = vadd.f32 %v63_v22, %v61_v23 }
  0xb1   :  { %66 = vst.msk [vmem:[%s142_s3] sm:$0xff] %vm65_vm0, %v64_v24 }
  0xb2   :  { %71 = vsyncpa [#allocation4], 1 }

</bundles_post_ra>
